<compile_context>
chip_gen: v6e
topology: v6e:2x2x1
jax: 0.10.0
libtpu: 0.0.40
codegen_flags: <defaults>
</compile_context>

<pallas_src>
import numpy as np
import jax
import jax.numpy as jnp
from jax.experimental import pallas as pl
from jax.experimental.pallas import tpu as pltpu

LANE = 128
BLOCK_ROWS_MAX = 4096   # 4096 x 128 x 4B = 2 MiB per f32 block.
                        # x + noise + out, double buffered: ~12 MiB live.
VMEM_LIMIT_BYTES = 32 * 1024 * 1024   # > v5e 16 MiB scoped default, < v7x 64 MiB physical.


def concrete_dropout_kernel(scalars_ref, x_ref, u_ref, o_ref):
    """Elementwise concrete-dropout hot path.

    scalars_ref : (2,) f32 SMEM -- [logit(p), 1/(1-p)]
    x_ref       : (block_rows, 128) tile of the flattened input (input dtype)
    u_ref       : (block_rows, 128) f32 tile of uniform [0,1) noise
    o_ref       : (block_rows, 128) tile of the output (input dtype)
    """
    eps = jnp.float32(1e-7)
    inv_temp = jnp.float32(10.0)          # 1 / temp, temp = 0.1

    logit_p = scalars_ref[0]
    inv_retain = scalars_ref[1]

    x = x_ref[...].astype(jnp.float32)
    u = u_ref[...]

    # drop_logit = logit(p) + log(u+eps) - log(1-u+eps)
    #            = logit(p) + log((u+eps) / (1-u+eps))     (single log + recip)
    z = logit_p + jnp.log((u + eps) / (1.0 - u + eps))
    # random_tensor = 1 - sigmoid(z/temp) = sigmoid(-z/temp)
    #               = 0.5 * (1 + tanh(-0.5 * z / temp))    (single tanh on EUP)
    keep = 0.5 * (1.0 + jnp.tanh(-0.5 * z * inv_temp))

    o_ref[...] = (x * keep * inv_retain).astype(o_ref.dtype)


def concrete_dropout_forward(x, p_logit, noise_key,
                             dropout_regularizer=1e-5, channel_wise=False):
    """Mirrors ConcreteDropout.forward for channel_wise=False.

    Returns (out, regularizer_scalar).
    """
    assert not channel_wise, "channel_wise=False variant implemented"
    # TODO(synk): channel_wise=True path (noise per (N, C, 1) + repeat along W) not implemented.

    orig_dtype = x.dtype
    orig_shape = x.shape
    total = x.size
    eps = jnp.float32(1e-7)

    p = jax.nn.sigmoid(p_logit.astype(jnp.float32))           # shape (1,)
    p_s = p[0]
    logit_p = jnp.log(p_s + eps) - jnp.log(1.0 - p_s + eps)
    inv_retain = 1.0 / (1.0 - p_s)
    scalars = jnp.stack([logit_p, inv_retain]).astype(jnp.float32)   # (2,) -> SMEM

    # Sublane granularity: 8 for 32-bit dtypes, 16 for packed 16-bit dtypes.
    sub = 16 if jnp.dtype(orig_dtype).itemsize < 4 else 8
    pad = (-total) % (sub * LANE)
    rows = (total + pad) // LANE                 # multiple of `sub`

    xf = x.reshape(-1)
    if pad:
        # Rare unaligned case; aligned conv-style feature maps skip this.
        xf = jnp.pad(xf, (0, pad))
    x2 = xf.reshape(rows, LANE)

    # Uniform noise like torch.rand_like(x), generated directly at the padded
    # lane-dense shape (no pad copy for the noise slab).
    u2 = jax.random.uniform(noise_key, (rows, LANE), dtype=jnp.float32)

    block_rows = rows if rows <= BLOCK_ROWS_MAX else BLOCK_ROWS_MAX
    grid = (pl.cdiv(rows, block_rows),)

    out2 = pl.pallas_call(
        concrete_dropout_kernel,
        out_shape=jax.ShapeDtypeStruct((rows, LANE), orig_dtype),
        grid=grid,
        in_specs=[
            pl.BlockSpec(memory_space=pltpu.MemorySpace.SMEM),   # scalars
            pl.BlockSpec((block_rows, LANE), lambda i: (i, 0)),  # x tile
            pl.BlockSpec((block_rows, LANE), lambda i: (i, 0)),  # noise tile
        ],
        out_specs=pl.BlockSpec((block_rows, LANE), lambda i: (i, 0)),
        compiler_params=pltpu.CompilerParams(
            dimension_semantics=("parallel",),
            vmem_limit_bytes=VMEM_LIMIT_BYTES),
    )(scalars, x2, u2)

    if pad:
        out = out2.reshape(-1)[:total].reshape(orig_shape)
    else:
        out = out2.reshape(orig_shape)

    # Scalar regularizer: (p log p + (1-p) log(1-p)) * dropout_regularizer * input_dim
    if channel_wise:
        input_dim = orig_shape[1]
    else:
        input_dim = int(np.prod(orig_shape[1:]))
    reg = p * jnp.log(p) + (1.0 - p) * jnp.log(1.0 - p)
    reg = reg * (dropout_regularizer * input_dim)
    return out, reg.mean()


if __name__ == "__main__":
    key = jax.random.PRNGKey(0)
    k_x, k_p, k_noise = jax.random.split(key, 3)

    # Deterministic parameter init, same scheme as torch.nn.Parameter(
    #   torch.empty(1).uniform_(init_min, init_max)) with init_range=(0.1, 0.3).
    init_range = (0.1, 0.3)
    init_min = float(np.log(init_range[0]) - np.log(1.0 - init_range[0]))
    init_max = float(np.log(init_range[1]) - np.log(1.0 - init_range[1]))
    p_logit = jax.random.uniform(k_p, (1,), minval=init_min, maxval=init_max,
                                 dtype=jnp.float32)

    # Small NCHW input consistent with a conv-style feature map.
    x = jax.random.normal(k_x, (2, 4, 16, 16), dtype=jnp.float32)

    out, reg = concrete_dropout_forward(x, p_logit, k_noise,
                                        dropout_regularizer=1e-5,
                                        channel_wise=False)
    out = jax.block_until_ready(out)
    reg = jax.block_until_ready(reg)

    assert out.shape == x.shape and out.dtype == x.dtype
    assert reg.shape == ()
    assert bool(jnp.all(jnp.isfinite(out)))

    # Sanity: output equals x * keep / (1-p) with keep in (0,1) -> |out| <= |x|/(1-p).
    p_val = float(jax.nn.sigmoid(p_logit)[0])
    assert bool(jnp.all(jnp.abs(out) <= jnp.abs(x) / (1.0 - p_val) + 1e-5))

    print("KERNEL_OK")
</pallas_src>

<mosaic_0001>
module attributes {stable_mosaic.version = 11 : i64} {
  func.func @concrete_dropout_kernel(%arg0: i32, %arg1: memref<2xf32, #tpu.memory_space<smem>>, %arg2: memref<16x128xf32, #tpu.memory_space<vmem>>, %arg3: memref<16x128xf32, #tpu.memory_space<vmem>>, %arg4: memref<16x128xf32, #tpu.memory_space<vmem>>) attributes {dimension_semantics = [#tpu.dimension_semantics<parallel>], iteration_bounds = array<i64: 1>, scalar_prefetch = 0 : i64, scratch_operands = 0 : i64, tpu.core_type = #tpu.core_type<tc>, window_params = [{transform_indices = @transform_0, window_bounds = array<i64: 2>}, {transform_indices = @transform_1, window_bounds = array<i64: 16, 128>}, {transform_indices = @transform_2, window_bounds = array<i64: 16, 128>}, {transform_indices = @transform_3, window_bounds = array<i64: 16, 128>}]} {
    %c0 = arith.constant 0 : index
    %0 = memref.load %arg1[%c0] : memref<2xf32, #tpu.memory_space<smem>>
    %c1 = arith.constant 1 : index
    %1 = memref.load %arg1[%c1] : memref<2xf32, #tpu.memory_space<smem>>
    %c0_0 = arith.constant 0 : index
    %c0_1 = arith.constant 0 : index
    %2 = vector.load %arg2[%c0_0, %c0_1] : memref<16x128xf32, #tpu.memory_space<vmem>>, vector<16x128xf32>
    %c0_2 = arith.constant 0 : index
    %c0_3 = arith.constant 0 : index
    %3 = vector.load %arg3[%c0_2, %c0_3] : memref<16x128xf32, #tpu.memory_space<vmem>>, vector<16x128xf32>
    %cst = arith.constant 1.000000e-07 : f32
    %4 = vector.broadcast %cst : f32 to vector<16x128xf32>
    %5 = arith.addf %3, %4 : vector<16x128xf32>
    %cst_4 = arith.constant 1.000000e+00 : f32
    %6 = vector.broadcast %cst_4 : f32 to vector<16x128xf32>
    %7 = arith.subf %6, %3 : vector<16x128xf32>
    %cst_5 = arith.constant 1.000000e-07 : f32
    %8 = vector.broadcast %cst_5 : f32 to vector<16x128xf32>
    %9 = arith.addf %7, %8 : vector<16x128xf32>
    %10 = arith.divf %5, %9 : vector<16x128xf32>
    %11 = math.log %10 : vector<16x128xf32>
    %12 = vector.broadcast %0 : f32 to vector<16x128xf32>
    %13 = arith.addf %12, %11 : vector<16x128xf32>
    %cst_6 = arith.constant -5.000000e-01 : f32
    %14 = vector.broadcast %cst_6 : f32 to vector<16x128xf32>
    %15 = arith.mulf %14, %13 : vector<16x128xf32>
    %cst_7 = arith.constant 1.000000e+01 : f32
    %16 = vector.broadcast %cst_7 : f32 to vector<16x128xf32>
    %17 = arith.mulf %15, %16 : vector<16x128xf32>
    %18 = math.tanh %17 : vector<16x128xf32>
    %cst_8 = arith.constant 1.000000e+00 : f32
    %19 = vector.broadcast %cst_8 : f32 to vector<16x128xf32>
    %20 = arith.addf %19, %18 : vector<16x128xf32>
    %cst_9 = arith.constant 5.000000e-01 : f32
    %21 = vector.broadcast %cst_9 : f32 to vector<16x128xf32>
    %22 = arith.mulf %21, %20 : vector<16x128xf32>
    %23 = arith.mulf %2, %22 : vector<16x128xf32>
    %24 = vector.broadcast %1 : f32 to vector<16x128xf32>
    %25 = arith.mulf %23, %24 : vector<16x128xf32>
    %c0_10 = arith.constant 0 : index
    %c0_11 = arith.constant 0 : index
    %26 = vector.load %arg4[%c0_10, %c0_11] : memref<16x128xf32, #tpu.memory_space<vmem>>, vector<16x128xf32>
    tpu.vector_store %arg4[%c0_10, %c0_11], %25 {strides = array<i32>} : memref<16x128xf32, #tpu.memory_space<vmem>>, vector<16x128xf32>,
    return
  }
  func.func @transform_0(%arg0: i32) -> i32 {
    %c0_i32 = arith.constant 0 : i32
    %c0_i32_0 = arith.constant 0 : i32
    return %c0_i32 : i32
  }
  func.func @transform_1(%arg0: i32) -> (i32, i32) {
    %c0_i32 = arith.constant 0 : i32
    %c0_i32_0 = arith.constant 0 : i32
    return %arg0, %c0_i32 : i32, i32
  }
  func.func @transform_2(%arg0: i32) -> (i32, i32) {
    %c0_i32 = arith.constant 0 : i32
    %c0_i32_0 = arith.constant 0 : i32
    return %arg0, %c0_i32 : i32, i32
  }
  func.func @transform_3(%arg0: i32) -> (i32, i32) {
    %c0_i32 = arith.constant 0 : i32
    %c0_i32_0 = arith.constant 0 : i32
    return %arg0, %c0_i32 : i32, i32
  }
}

</mosaic_0001>

<bundles_post_ra>
// kernel: tpu_custom_call.1
= control target key start
LH: loop header
LB: loop body
LE: loop exit
PB: predicated region body
PF: predicated region fallthrough
CT: control target
= control target key end

     0   :  { %8 = vsyncpa [#allocation5], 0  ;;  %s255_s0 = inlined_call_operand.hbm [shape: f32[2], index: 0, kind: input, shape index: {}]   ;;  %s256_s1 = inlined_call_operand.hbm [shape: f32[16,128], index: 1, kind: input, shape index: {}]   ;;  %s257_s2 = inlined_call_operand.hbm [shape: f32[16,128], index: 2, kind: input, shape index: {}]   ;;  %s258_s3 = inlined_call_operand.hbm [shape: f32[16,128], index: 3, kind: output, shape index: {}]  }
   0x1   :  { %9 = vsyncpa [#allocation3], 0 }
   0x2   :  { %10 = vsyncpa [#allocation8], 0 }
   0x3   :  { %11 = vsyncpa [#allocation4], 0  ;;  %s208_s12 = smov [#allocation2]   ;;  %s209_s15 = smov [#allocation6]  }
   0x4   :  { %19 = dma.hbm_to_smem %s255_s0, 16, %s208_s12, [#allocation5]  }
   0x5   :  { %s25_s16 = sshll.u32 %s209_s15, 4  ;;  %s26_s16 = int_to_ptr.vmem [resolvable:$true] %s25_s16 }
   0x6   :  { %s148_s17 = scalar_lea.vmem %s26_s16, 256  ;;  %p153_p1 = scmp.lt.s32.totalorder %s26_s16, %s26_s16 }
   0x7   :  { %p149_p0 = scmp.ne.s32.totalorder %s26_s16, %s148_s17  ;;  %p154_p2 = scmp.lt.s32.totalorder %s148_s17, %s148_s17 }
   0x9   :  { %p155_p3 = por %p154_p2, %p153_p1 }
   0xb   :  { %p156_p4 = pnand %p155_p3, %p149_p0 }
   0xd   :  { %159 = shalt.err (!%p156_p4)
}
   0xe   :  { %s210_s18 = smov 128   ;;  %s211_s19 = smov 8  }
   0xf   :  { %31 = dma.hbm_to_vmem [thread:$0]  %s256_s1, 256, %s26_s16, [#allocation3], %s210_s18, %s210_s18, %s211_s19  }
  0x10   :  { %s212_s0 = smov [#allocation7]  }
  0x11   :  { %s37_s22 = sshll.u32 %s212_s0, 4  ;;  %s38_s22 = int_to_ptr.vmem [resolvable:$true] %s37_s22 }
  0x12   :  { %s168_s23 = scalar_lea.vmem %s38_s22, 256  ;;  %p173_p6 = scmp.lt.s32.totalorder %s38_s22, %s38_s22 }
  0x13   :  { %p169_p5 = scmp.ne.s32.totalorder %s38_s22, %s168_s23  ;;  %p174_p7 = scmp.lt.s32.totalorder %s168_s23, %s168_s23 }
  0x15   :  { %p175_p8 = por %p174_p7, %p173_p6 }
  0x17   :  { %p176_p9 = pnand %p175_p8, %p169_p5 }
  0x19   :  { %179 = shalt.err (!%p176_p9)
}
  0x1a   :  { %43 = dma.hbm_to_vmem [thread:$0]  %s257_s2, 256, %s38_s22, [#allocation8], %s210_s18, %s210_s18, %s211_s19  }
  0x1b   :  { %200 = dma.done.wait [#allocation5], 16  }
  0x1c   :  { %201 = vsyncadd [#allocation5], 4294967280 }
  0x1d   :  { %202 = dma.done.wait [#allocation3], 256  }
  0x1e   :  { %203 = vsyncadd [#allocation3], 4294967040 }
  0x1f   :  { %204 = dma.done.wait [#allocation8], 256  }
  0x20   :  { %205 = vsyncadd [#allocation8], 4294967040 }
  0x21   :  { %53 = sfence }
  0x22   :  { %v58_v0 = vld [vmem:[#allocation7] sm:$0xff]  ;;  %v59_v2 = vld [vmem:[#allocation7 + $0x8] sm:$0xff]  ;;  %s54_s1 = sld [smem:[#allocation2]]  ;;  %v56_v26 = vld [vmem:[#allocation6] sm:$0xff]  ;;  %s213_s26 = smov [#allocation9]  }
  0x23   :  { %v62_v1 = vsub.f32 1.0, %v58_v0  ;;  %v63_v3 = vsub.f32 1.0, %v59_v2  ;;  %v60_v6 = vadd.f32 1e-07, %v58_v0  ;;  %v61_v7 = vadd.f32 1e-07, %v59_v2 }
  0x24   :  { %s113_s2 = sld [smem:[#allocation2 + $0x1]]  ;;  %v57_v29 = vld [vmem:[#allocation6 + $0x8] sm:$0xff]  ;;  %s99_s27 = sshll.u32 %s213_s26, 4  ;;  %s100_s27 = int_to_ptr.vmem [resolvable:$true] %s99_s27 }
  0x25   :  { %v64_v4 = vadd.f32 1e-07, %v62_v1  ;;  %v65_v5 = vadd.f32 1e-07, %v63_v3  ;;  %s180_s28 = scalar_lea.vmem %s100_s27, 256  ;;  %p185_p11 = scmp.lt.s32.totalorder %s100_s27, %s100_s27 }
  0x26   :  { %p181_p10 = scmp.ne.s32.totalorder %s100_s27, %s180_s28  ;;  %p186_p12 = scmp.lt.s32.totalorder %s180_s28, %s180_s28 }
  0x27   :  { %120 = vrcp.f32 %v64_v4 }
  0x28   :  { %122 = vrcp.f32 %v65_v5  ;;  %v74_v13 = vstv %s54_s1  ;;  %p187_p13 = por %p186_p12, %p185_p11 }
  0x2a   :  { %v89_v30 = vstv %s113_s2  ;;  %p188_p0 = pnand %p187_p13, %p181_p10 }
  0x34   :  { %v121_v8 = vpop.eup %120 }
  0x35   :  { %v123_v9 = vpop.eup %122  ;;  %v67_v10 = vmul.f32 %v121_v8, %v60_v6 }
  0x36   :  { %v69_v11 = vmul.f32 %v123_v9, %v61_v7 }
  0x37   :  { %124 = vlog2.f32 %v67_v10 }
  0x38   :  { %126 = vlog2.f32 %v69_v11 }
  0x44   :  { %v125_v12 = vpop.eup %124 }
  0x45   :  { %v127_v14 = vpop.eup %126  ;;  %v71_v15 = vmul.f32 0.6931472, %v125_v12 }
  0x46   :  { %v73_v16 = vmul.f32 0.6931472, %v127_v14 }
  0x47   :  { %v75_v17 = vadd.f32 %v74_v13, %v71_v15 }
  0x48   :  { %v76_v18 = vadd.f32 %v74_v13, %v73_v16 }
  0x49   :  { %v77_v19 = vmul.f32 -0.5, %v75_v17 }
  0x4a   :  { %v78_v20 = vmul.f32 -0.5, %v76_v18 }
  0x4b   :  { %v79_v21 = vmul.f32 10.0, %v77_v19 }
  0x4c   :  { %v80_v22 = vmul.f32 10.0, %v78_v20 }
  0x4d   :  { %128 = vtanh.f32 %v79_v21 }
  0x4e   :  { %130 = vtanh.f32 %v80_v22 }
  0x5a   :  { %v129_v23 = vpop.eup %128 }
  0x5b   :  { %v131_v24 = vpop.eup %130  ;;  %v83_v25 = vadd.f32 1.0, %v129_v23 }
  0x5c   :  { %v84_v27 = vadd.f32 1.0, %v131_v24 }
  0x5d   :  { %v85_v28 = vmul.f32 0.5, %v83_v25 }
  0x5e   :  { %v86_v31 = vmul.f32 0.5, %v84_v27 }
  0x5f   :  { %v87_v32 = vmul.f32 %v85_v28, %v56_v26 }
  0x60   :  { %v88_v33 = vmul.f32 %v86_v31, %v57_v29 }
  0x61   :  { %v90_v34 = vmul.f32 %v89_v30, %v87_v32 }
  0x62   :  { %v91_v35 = vmul.f32 %v89_v30, %v88_v33 }
  0x63   :  { %92 = vst [vmem:[#allocation9] sm:$0xff] %v90_v34 }
  0x64   :  { %93 = vst [vmem:[#allocation9 + $0x8] sm:$0xff] %v91_v35 }
  0x65   :  { %191 = shalt.err (!%p188_p0)
}
  0x66   :  { %105 = dma.vmem_to_hbm [thread:$0]  %s100_s27, 256, %s258_s3, [#allocation4], %s210_s18, %s210_s18, %s211_s19  }
  0x67   :  { %206 = dma.done.wait [#allocation4], 256  }
  0x68   :  { %207 = vsyncadd [#allocation4], 4294967040 }
  0x69   :  { %109 = vsyncpa [#allocation3], 1 }
  0x6a   :  { %110 = vsyncpa [#allocation8], 1 }
  0x6b   :  { %111 = vsyncpa [#allocation4], 1 }
  0x6c   :  { %112 = vsyncpa [#allocation5], 1 }

</bundles_post_ra>
